<compile_context>
chip_gen: v7x
topology: tpu7x:2x2x1
jax: 0.10.0
libtpu: 0.0.40
codegen_flags: <defaults>
</compile_context>

<pallas_src>
import functools

import jax
import jax.numpy as jnp
from jax import lax
from jax.experimental import pallas as pl
from jax.experimental.pallas import tpu as pltpu


def _cls_loss_partial_kernel(logits_ref, side_ref, part_ref, *, batch_size):
    """Per-tile partial sums for weighted cross-entropy + top-1 accuracy.

    logits_ref: (TILE_B, C)  native dtype (bf16/f32), upcast in-kernel.
    side_ref:   (TILE_B, 2)  f32 sideband: col 0 = w[t_i] (0 for padded rows),
                             col 1 = x[i, t_i] (target logit, 0 for padded rows).
    part_ref:   (1, 8, 128)  f32 partial slab: sublane 0, lanes 0/1/2 hold
                             [sum w*nll, sum w, #correct], rest zero.
    """
    x = logits_ref[...].astype(jnp.float32)            # (TB, C)
    tb, c = x.shape

    # Valid-row mask for the (possibly out-of-bounds) tail of the last tile.
    row = lax.broadcasted_iota(jnp.int32, (tb, 1), 0) + pl.program_id(0) * tb
    row_valid = row < batch_size                       # (TB, 1) bool
    # Mask BEFORE max/exp so unspecified OOB rows can never produce inf/NaN.
    x = jnp.where(row_valid, x, 0.0)

    side = side_ref[...]                               # (TB, 2) f32
    wt = side[:, 0:1]                                  # (TB, 1) w[t_i]
    logit_t = side[:, 1:2]                             # (TB, 1) x[i, t_i]

    # Stable log-sum-exp.
    m = jnp.max(x, axis=-1, keepdims=True)                               # (TB, 1)
    lse = m + jnp.log(jnp.sum(jnp.exp(x - m), axis=-1, keepdims=True))   # (TB, 1)
    nll = lse - logit_t                                                  # (TB, 1)

    vmask = row_valid.astype(jnp.float32)
    num = jnp.sum(vmask * wt * nll)      # scalar: sum_i w[t_i] * nll_i
    den = jnp.sum(vmask * wt)            # scalar: sum_i w[t_i]
    # Top-1 "correct" count: target logit equals the row max (ties counted correct).
    correct = jnp.sum(vmask * (logit_t >= m).astype(jnp.float32))

    # Lane-dense partial slab (unmasked full-vreg store).
    lane = lax.broadcasted_iota(jnp.int32, (1, 8, 128), 2)
    sub = lax.broadcasted_iota(jnp.int32, (1, 8, 128), 1)
    slab = jnp.where((sub == 0) & (lane == 0), num,
           jnp.where((sub == 0) & (lane == 1), den,
           jnp.where((sub == 0) & (lane == 2), correct, 0.0)))
    part_ref[...] = slab


def _round_up(x, m):
    return (x + m - 1) // m * m


def _vmem_budget_and_limit():
    """Generation-aware VMEM limit (~0.5x capacity) and tile-sizing budget (~0.25x)."""
    cap = 64 * 1024 * 1024  # conservative fallback (v7x per-TC capacity)
    try:
        info = pltpu.get_tpu_info()
        cap = int(getattr(info, "vmem_capacity_bytes", cap)) or cap
    except Exception:
        pass
    limit = max(16 * 1024 * 1024, int(cap * 0.5))
    budget = limit // 2
    return budget, limit


def _choose_tile_b(B, C, itemsize, vmem_budget_bytes):
    """Batch-tile size fitting double-buffered native input + f32 upcast/exp temps."""
    # 2x double-buffered native rows + ~4 live f32 words/elem (x_f32, exp, temps) + sideband
    per_row = C * (2 * itemsize + 16) + 256
    tile = vmem_budget_bytes // max(per_row, 1)
    tile = max(8, min((int(tile) // 8) * 8, 8192))
    b8 = _round_up(max(B, 1), 8)
    tile = min(tile, b8)
    # v7x megacore: keep >= 2 grid steps whenever the batch allows it so both TCs work.
    if b8 >= 16:
        tile = min(tile, max(8, (b8 // 2 // 8) * 8))
    return int(tile)


def image_classification_loss(outputs, targets, class_weights_for_each_class=None,
                              class_weights=None, tile_b=None):
    """JAX/Pallas equivalent of ImageClassificationLoss.forward.

    outputs: [B, C] float logits (any float dtype; streamed in native dtype)
    targets: [B] int class indices
    class_weights_for_each_class: optional [C] per-class weights
    class_weights: scalar stored in weight_dict (does not affect compute)
    """
    B, C = outputs.shape
    itemsize = jnp.dtype(outputs.dtype).itemsize
    vmem_budget, vmem_limit = _vmem_budget_and_limit()
    if tile_b is None:
        tile_b = _choose_tile_b(B, C, itemsize, vmem_budget)
    tile_b = max(8, (int(tile_b) // 8) * 8)
    grid_b = -(-B // tile_b)              # cdiv
    padded_b = grid_b * tile_b            # only the tiny sideband is padded

    tgt = targets.astype(jnp.int32)
    tgt_safe = jnp.clip(tgt, 0, C - 1)
    # Per-sample weight w[t_i] and target logit x[i, t_i] gathered in the wrapper
    # (tiny B-element gathers) instead of in-kernel onehot passes.
    # NOTE: out-of-range targets are clipped (torch CrossEntropyLoss would raise).
    if class_weights_for_each_class is None:
        w_t = jnp.ones((B,), jnp.float32)
    else:
        w = jnp.asarray(class_weights_for_each_class, jnp.float32)
        w_t = w[tgt_safe]
    logit_t = jnp.take_along_axis(outputs, tgt_safe[:, None], axis=-1)[:, 0]
    side = jnp.stack([w_t, logit_t.astype(jnp.float32)], axis=-1)        # (B, 2)
    pad = padded_b - B
    if pad:
        side = jnp.pad(side, ((0, pad), (0, 0)))                         # zeros: no effect

    parts = pl.pallas_call(
        functools.partial(_cls_loss_partial_kernel, batch_size=B),
        out_shape=jax.ShapeDtypeStruct((grid_b, 8, 128), jnp.float32),
        grid=(grid_b,),
        in_specs=[
            pl.BlockSpec((tile_b, C), lambda i: (i, 0)),   # logits tile (native dtype)
            pl.BlockSpec((tile_b, 2), lambda i: (i, 0)),   # merged sideband [w_t, x_t]
        ],
        out_specs=pl.BlockSpec((1, 8, 128), lambda i: (i, 0, 0)),
        compiler_params=pltpu.CompilerParams(
            dimension_semantics=("parallel",),
            vmem_limit_bytes=vmem_limit,
        ),
    )(outputs, side)

    # Final reduction / normalization in the wrapper (cheap, keeps the grid parallel).
    totals = jnp.sum(parts, axis=0)                   # (8, 128)
    loss = totals[0, 0] / totals[0, 1]                # NaN if sum of selected weights is 0 (matches torch)
    err = (1.0 - totals[0, 2] / jnp.float32(B)) * 100.0

    # weight_dict analogue (scalar hyper-parameter, not part of the compute)
    _weight_dict = {"loss_image_classify": class_weights}
    return {
        "loss_image_classify": loss,
        "image_classification_error": err,
    }


def _reference(outputs, targets, weights):
    """Pure-JAX reference matching torch's CrossEntropyLoss(weight=...)."""
    logits = outputs.astype(jnp.float32)
    lse = jax.scipy.special.logsumexp(logits, axis=-1)
    logit_t = jnp.take_along_axis(logits, targets[:, None], axis=-1)[:, 0]
    nll = lse - logit_t
    w_t = weights[targets]
    loss = jnp.sum(w_t * nll) / jnp.sum(w_t)
    pred = jnp.argmax(logits, axis=-1)
    acc = jnp.mean((pred == targets).astype(jnp.float32))
    return loss, (1.0 - acc) * 100.0


if __name__ == "__main__":
    key = jax.random.PRNGKey(0)

    # Case 1: f32 logits, per-class weights, B not a multiple of tile_b
    #         (exercises the no-pad / in-kernel tail-masking path), 2-step grid.
    B, C = 13, 24
    k1, k2 = jax.random.split(key)
    outputs = jax.random.normal(k1, (B, C), dtype=jnp.float32)
    targets = jax.random.randint(k2, (B,), 0, C, dtype=jnp.int32)
    class_w = jnp.linspace(0.5, 1.5, C, dtype=jnp.float32)

    res = image_classification_loss(
        outputs, targets,
        class_weights_for_each_class=class_w,
        class_weights=2.0,
        tile_b=8,
    )
    loss = jax.block_until_ready(res["loss_image_classify"])
    err = jax.block_until_ready(res["image_classification_error"])
    ref_loss, ref_err = _reference(outputs, targets, class_w)
    assert jnp.allclose(loss, ref_loss, rtol=1e-5, atol=1e-5), (loss, ref_loss)
    assert jnp.allclose(err, ref_err, rtol=1e-5, atol=1e-5), (err, ref_err)

    # Case 2: bf16 logits streamed in native dtype, no class weights, auto tile size
    #         (auto-sizer caps to >=2 grid steps for megacore).
    B2, C2 = 32, 128
    k3, k4 = jax.random.split(k1)
    out2 = jax.random.normal(k3, (B2, C2), dtype=jnp.float32).astype(jnp.bfloat16)
    tgt2 = jax.random.randint(k4, (B2,), 0, C2, dtype=jnp.int32)
    res2 = image_classification_loss(out2, tgt2)
    loss2 = jax.block_until_ready(res2["loss_image_classify"])
    err2 = jax.block_until_ready(res2["image_classification_error"])
    ref_loss2, ref_err2 = _reference(out2, tgt2, jnp.ones((C2,), jnp.float32))
    assert jnp.allclose(loss2, ref_loss2, rtol=1e-4, atol=1e-4), (loss2, ref_loss2)
    assert jnp.allclose(err2, ref_err2, rtol=1e-4, atol=1e-4), (err2, ref_err2)

    print("KERNEL_OK")
</pallas_src>

<mosaic_0001>
module attributes {stable_mosaic.version = 11 : i64} {
  func.func @_cls_loss_partial_kernel(%arg0: i32, %arg1: memref<8x24xf32, #tpu.memory_space<vmem>>, %arg2: memref<8x2xf32, #tpu.memory_space<vmem>>, %arg3: memref<1x8x128xf32, #tpu.memory_space<vmem>>) attributes {dimension_semantics = [#tpu.dimension_semantics<parallel>], iteration_bounds = array<i64: 2>, scalar_prefetch = 0 : i64, scratch_operands = 0 : i64, tpu.core_type = #tpu.core_type<tc>, window_params = [{transform_indices = @transform_0, window_bounds = array<i64: 8, 24>}, {transform_indices = @transform_1, window_bounds = array<i64: 8, 2>}, {transform_indices = @transform_2, window_bounds = array<i64: 1, 8, 128>}]} {
    %c0 = arith.constant 0 : index
    %c0_0 = arith.constant 0 : index
    %0 = vector.load %arg1[%c0, %c0_0] : memref<8x24xf32, #tpu.memory_space<vmem>>, vector<8x24xf32>
    %1 = tpu.iota {dimensions = array<i32: 0>} : vector<8x1xi32>
    %c8_i32 = arith.constant 8 : i32
    %2 = arith.muli %arg0, %c8_i32 : i32
    %3 = vector.broadcast %2 : i32 to vector<8x1xi32>
    %4 = arith.addi %1, %3 : vector<8x1xi32>
    %c13_i32 = arith.constant 13 : i32
    %5 = vector.broadcast %c13_i32 : i32 to vector<8x1xi32>
    %6 = arith.cmpi slt, %4, %5 : vector<8x1xi32>
    %cst = arith.constant 0.000000e+00 : f32
    %7 = vector.shape_cast %6 : vector<8x1xi1> to vector<8x1xi1>
    %8 = vector.broadcast %7 : vector<8x1xi1> to vector<8x24xi1>
    %9 = vector.broadcast %cst : f32 to vector<8x24xf32>
    %10 = arith.select %8, %0, %9 : vector<8x24xi1>, vector<8x24xf32>
    %c0_1 = arith.constant 0 : index
    %c0_2 = arith.constant 0 : index
    %11 = vector.load %arg2[%c0_1, %c0_2] : memref<8x2xf32, #tpu.memory_space<vmem>>, vector<8x2xf32>
    %12 = vector.extract_strided_slice %11 {offsets = [0, 0], sizes = [8, 1], strides = [1, 1]} : vector<8x2xf32> to vector<8x1xf32>
    %13 = vector.extract_strided_slice %11 {offsets = [0, 1], sizes = [8, 1], strides = [1, 1]} : vector<8x2xf32> to vector<8x1xf32>
    %cst_3 = arith.constant dense<0xFF800000> : vector<8xf32>
    %14 = vector.multi_reduction <maximumf>, %10, %cst_3 [1] : vector<8x24xf32> to vector<8xf32>
    %15 = vector.shape_cast %14 : vector<8xf32> to vector<8x1xf32>
    %16 = vector.broadcast %15 : vector<8x1xf32> to vector<8x24xf32>
    %17 = arith.subf %10, %16 : vector<8x24xf32>
    %18 = math.exp %17 : vector<8x24xf32>
    %cst_4 = arith.constant dense<0.000000e+00> : vector<8xf32>
    %19 = vector.multi_reduction <add>, %18, %cst_4 [1] : vector<8x24xf32> to vector<8xf32>
    %20 = vector.shape_cast %19 : vector<8xf32> to vector<8x1xf32>
    %21 = math.log %20 : vector<8x1xf32>
    %22 = arith.addf %15, %21 : vector<8x1xf32>
    %23 = arith.subf %22, %13 : vector<8x1xf32>
    %24 = arith.extui %6 : vector<8x1xi1> to vector<8x1xi32>
    %25 = arith.sitofp %24 : vector<8x1xi32> to vector<8x1xf32>
    %26 = arith.mulf %25, %12 : vector<8x1xf32>
    %27 = arith.mulf %26, %23 : vector<8x1xf32>
    %28 = vector.shape_cast %27 : vector<8x1xf32> to vector<1x8x1xf32>
    %cst_5 = arith.constant dense<0.000000e+00> : vector<1xf32>
    %29 = vector.multi_reduction <add>, %28, %cst_5 [1, 2] : vector<1x8x1xf32> to vector<1xf32>
    %30 = vector.shape_cast %29 : vector<1xf32> to vector<1x1x1xf32>
    %31 = vector.extract %30[0, 0, 0] : f32 from vector<1x1x1xf32>
    %32 = arith.mulf %25, %12 : vector<8x1xf32>
    %33 = vector.shape_cast %32 : vector<8x1xf32> to vector<1x8x1xf32>
    %cst_6 = arith.constant dense<0.000000e+00> : vector<1xf32>
    %34 = vector.multi_reduction <add>, %33, %cst_6 [1, 2] : vector<1x8x1xf32> to vector<1xf32>
    %35 = vector.shape_cast %34 : vector<1xf32> to vector<1x1x1xf32>
    %36 = vector.extract %35[0, 0, 0] : f32 from vector<1x1x1xf32>
    %37 = arith.cmpf oge, %13, %15 : vector<8x1xf32>
    %38 = arith.extui %37 : vector<8x1xi1> to vector<8x1xi32>
    %39 = arith.sitofp %38 : vector<8x1xi32> to vector<8x1xf32>
    %40 = arith.mulf %25, %39 : vector<8x1xf32>
    %41 = vector.shape_cast %40 : vector<8x1xf32> to vector<1x8x1xf32>
    %cst_7 = arith.constant dense<0.000000e+00> : vector<1xf32>
    %42 = vector.multi_reduction <add>, %41, %cst_7 [1, 2] : vector<1x8x1xf32> to vector<1xf32>
    %43 = vector.shape_cast %42 : vector<1xf32> to vector<1x1x1xf32>
    %44 = vector.extract %43[0, 0, 0] : f32 from vector<1x1x1xf32>
    %45 = tpu.iota {dimensions = array<i32: 2>} : vector<1x8x128xi32>
    %46 = tpu.iota {dimensions = array<i32: 1>} : vector<1x8x128xi32>
    %c0_i32 = arith.constant 0 : i32
    %47 = vector.broadcast %c0_i32 : i32 to vector<1x8x128xi32>
    %48 = arith.cmpi eq, %46, %47 : vector<1x8x128xi32>
    %c0_i32_8 = arith.constant 0 : i32
    %49 = vector.broadcast %c0_i32_8 : i32 to vector<1x8x128xi32>
    %50 = arith.cmpi eq, %45, %49 : vector<1x8x128xi32>
    %51 = arith.andi %48, %50 : vector<1x8x128xi1>
    %c0_i32_9 = arith.constant 0 : i32
    %52 = vector.broadcast %c0_i32_9 : i32 to vector<1x8x128xi32>
    %53 = arith.cmpi eq, %46, %52 : vector<1x8x128xi32>
    %c1_i32 = arith.constant 1 : i32
    %54 = vector.broadcast %c1_i32 : i32 to vector<1x8x128xi32>
    %55 = arith.cmpi eq, %45, %54 : vector<1x8x128xi32>
    %56 = arith.andi %53, %55 : vector<1x8x128xi1>
    %c0_i32_10 = arith.constant 0 : i32
    %57 = vector.broadcast %c0_i32_10 : i32 to vector<1x8x128xi32>
    %58 = arith.cmpi eq, %46, %57 : vector<1x8x128xi32>
    %c2_i32 = arith.constant 2 : i32
    %59 = vector.broadcast %c2_i32 : i32 to vector<1x8x128xi32>
    %60 = arith.cmpi eq, %45, %59 : vector<1x8x128xi32>
    %61 = arith.andi %58, %60 : vector<1x8x128xi1>
    %cst_11 = arith.constant 0.000000e+00 : f32
    %62 = vector.broadcast %44 : f32 to vector<1x8x128xf32>
    %63 = vector.broadcast %cst_11 : f32 to vector<1x8x128xf32>
    %64 = arith.select %61, %62, %63 : vector<1x8x128xi1>, vector<1x8x128xf32>
    %65 = vector.broadcast %36 : f32 to vector<1x8x128xf32>
    %66 = arith.select %56, %65, %64 : vector<1x8x128xi1>, vector<1x8x128xf32>
    %67 = vector.broadcast %31 : f32 to vector<1x8x128xf32>
    %68 = arith.select %51, %67, %66 : vector<1x8x128xi1>, vector<1x8x128xf32>
    %c0_12 = arith.constant 0 : index
    %c0_13 = arith.constant 0 : index
    %c0_14 = arith.constant 0 : index
    %69 = vector.load %arg3[%c0_12, %c0_13, %c0_14] : memref<1x8x128xf32, #tpu.memory_space<vmem>>, vector<1x8x128xf32>
    tpu.vector_store %arg3[%c0_12, %c0_13, %c0_14], %68 {strides = array<i32>} : memref<1x8x128xf32, #tpu.memory_space<vmem>>, vector<1x8x128xf32>,
    return
  }
  func.func @transform_0(%arg0: i32) -> (i32, i32) {
    %c0_i32 = arith.constant 0 : i32
    %c0_i32_0 = arith.constant 0 : i32
    return %arg0, %c0_i32 : i32, i32
  }
  func.func @transform_1(%arg0: i32) -> (i32, i32) {
    %c0_i32 = arith.constant 0 : i32
    %c0_i32_0 = arith.constant 0 : i32
    return %arg0, %c0_i32 : i32, i32
  }
  func.func @transform_2(%arg0: i32) -> (i32, i32, i32) {
    %c0_i32 = arith.constant 0 : i32
    %c0_i32_0 = arith.constant 0 : i32
    %c0_i32_1 = arith.constant 0 : i32
    return %arg0, %c0_i32, %c0_i32_0 : i32, i32, i32
  }
}

</mosaic_0001>

<bundles_post_ra>
// kernel: tpu_custom_call.1
= control target key start
LH: loop header
LB: loop body
LE: loop exit
PB: predicated region body
PF: predicated region fallthrough
CT: control target
= control target key end

     0   :  { %7 = vsyncpa [#allocation3], 0  ;;  %s587_s0 = inlined_call_operand.vmem [shape: f32[13,24], index: 0, kind: input, shape index: {}]   ;;  %s588_s1 = inlined_call_operand.vmem [shape: f32[16,2], index: 1, kind: input, shape index: {}]   ;;  %s589_s2 = inlined_call_operand.hbm [shape: f32[2,8,128], index: 2, kind: output, shape index: {}]  }
   0x1   :  { %9 = vsyncpa [#allocation3 + $0x1], 0  ;;  %s475_s9 = smov 0   ;;  %s477_s10 = smov 0  }
   0x2   :  { %s479_s11 = smov 0   ;;  %s481_s12 = smov 0  }
   0x3 LB: > { %s496_s13 = sadd.s32 4294967295, %s455_s12   ;;  %s328_s14 = sadd.s32 4294967294, %s455_s12   ;;  %s455_s12 = sphi %s481_s12, %s595_s12   ;;  %s451_s11 = sphi %s479_s11, %s594_s11   ;;  %s447_s10 = sphi %s477_s10, %s593_s10   ;;  %s443_s9 = sphi %s475_s9, %s592_s9  }
   0x4   : > { %s500_s15 = sadd.s32 1, %s455_s12   ;;  %s74_s16 = sadd.s32 1, %s451_s11 }
   0x5   : > { %s71_s17 = ssub.s32 %s455_s12, %s500_s15  ;;  %p84_p0 = scmp.ne.s32.totalorder %s451_s11, %s447_s10 }
   0x6   : > { %p72_p1 = scmp.eq.s32.totalorder %s71_s17, 0  ;;  %p85_p2 = scmp.eq.s32.totalorder %s496_s13, 1 }
   0x7   : > { %p90_p3 = scmp.ne.s32.totalorder %s447_s10, %s443_s9  ;;  %p91_p4 = scmp.eq.s32.totalorder %s328_s14, 1 }
   0x8   : > { %s511_s18 = scalar_select %p72_p1, %s451_s11, %s74_s16  }
   0x9   : > { %p513_p5 = por %p85_p2, %p84_p0  ;;  %p517_p6 = por %p91_p4, %p90_p3 }
   0xa   : > { %p331_p7 = scmp.ge.s32.totalorder %s455_s12, 1  ;;  %p123_p8 = scmp.lt.s32.totalorder %s455_s12, 3 }
   0xc   : > { %p124_p9 = pnand %p331_p7, %p123_p8 }
   0xd   : > { %p148_p10 = scmp.lt.s32.totalorder (!%p124_p9), %s496_s13, 1  ;;  %v157_v0 = vlaneseq (!%p124_p9)  ;;  %s335_s21 = sshll.u32 (!%p124_p9), %s496_s13, 3  ;;  %vm167_vm0 = vcmask (!%p124_p9), 195584   ;;  %v457_v8 = vmov (!%p124_p9), 0.0   ;;  %vm188_vm3 = vcmask (!%p124_p9), 7168  }
   0xe   : > { %127 = sbr.rel (%p124_p9) target bundleno = 689 (0x2b1), region = 28  ;;  %v160_v1 = vstv (!%p124_p9), %s335_s21  ;;  %s458_s30 = smov (!%p124_p9), 127  }
   0xf   : > { %v527_v2 = vshrl.u32 (!%p124_p9), %v157_v0, 7  ;;  %s145_s3 = sand.u32 (!%p124_p9), 1, %s447_s10   ;;  %v228_v50 = vand.u32 (!%p124_p9), 127, %v157_v0  ;;  %s339_s7 = sshll.u32 (!%p124_p9), %s496_s13, 7 }
  0x10   : > { %s332_s4 = sshll.u32 (!%p124_p9), %s145_s3, 3  ;;  %s459_s24 = smov (!%p124_p9), [#allocation2]  }
  0x11   : > { %v161_v3 = vadd.s32 (!%p124_p9), %v160_v1, %v527_v2  ;;  %vm229_vm4 = vcmp.eq.s32.totalorder (!%p124_p9), %v527_v2, 0  ;;  %vm234_vm5 = vcmp.eq.s32.totalorder (!%p124_p9), %v228_v50, 2  ;;  %vm232_vm6 = vcmp.eq.s32.totalorder (!%p124_p9), %v228_v50, 1  ;;  %s147_s14 = scalar_lea.vmem (!%p124_p9), [#allocation2], %s332_s4  ;;  %s397_s25 = sshll.u32 (!%p124_p9), %s459_s24, 4  ;;  %s398_s25 = int_to_ptr.vmem [resolvable:$false] %s397_s25 }
  0x12   : > { %vm230_vm7 = vcmp.eq.s32.totalorder (!%p124_p9), %v228_v50, 0  ;;  %vm235_vm8 = vmand (!%p124_p9), %vm229_vm4, %vm234_vm5  ;;  %s257_s16 = sshll.u32 (!%p124_p9), %s147_s14, 4  ;;  %s547_s16 = int_to_ptr.vmem [resolvable:$true] %s257_s16 }
  0x13   : > { %vm162_vm1 = vcmp.lt.s32.totalorder (!%p124_p9), %v161_v3, 13  ;;  %vm233_vm9 = vmand (!%p124_p9), %vm229_vm4, %vm232_vm6  ;;  %p400_p0 = scmp.lt.s32.totalorder (!%p124_p9), %s547_s16, %s398_s25 }
  0x14   : > { %v336_v9 = vsel (!%p124_p9), %vm162_vm1, 1.0, %v457_v8  ;;  %vm231_vm10 = vmand (!%p124_p9), %vm229_vm4, %vm230_vm7 }
  0x15   : > { %s149_s22 = scalar_select %p148_p10, %s496_s13, 1 }
  0x16   : > { %s244_s13 = scalar_lea.sflag [#allocation3], %s145_s3 }
  0x17   : > { %s333_s23 = sshll.u32 %s149_s22, 3  ;;  %s545_s22 = scalar_lea.hbm %s589_s2, %s339_s7 }
  0x18   : > { %s151_s26 = scalar_lea.vmem %s587_s0, %s333_s23  ;;  %s155_s29 = scalar_lea.vmem %s588_s1, %s333_s23 }
  0x19   : > { %v156_v4 = vld [vmem:[%s151_s26] sm:$0xff]  ;;  %s393_s23 = scalar_lea.vmem %s547_s16, 128  ;;  %s399_s26 = scalar_lea.vmem %s398_s25, 256 }
  0x1a   : > { %v165_v5 = vsel %vm162_vm1, %v156_v4, 0.0  ;;  %v166_v7 = vld [vmem:[%s155_s29] sm:$0xff]  ;;  %p394_p11 = scmp.ne.s32.totalorder %s547_s16, %s393_s23  ;;  %p401_p1 = scmp.lt.s32.totalorder %s399_s26, %s393_s23 }
  0x1b   : > { %v168_v6 = vsel %vm167_vm0, %v165_v5, -inf  ;;  %v182_v17 = vmul.f32 %v336_v9, %v166_v7 }
  0x1c   : > { %169 = vmax.xlane.f32.xlu0 %v168_v6  ;;  %p395_p12 = pnand %p394_p11, %p513_p5  ;;  %p402_p2 = por %p401_p1, %p400_p0 }
  0x1d   : > { %v199_v23 = vsel %vm188_vm3, %v182_v17, 0.0 }
  0x1e   : > { %p396_p13 = pneg %p395_p12 }
  0x20   : > { %p403_p3 = pnand %p402_p2, %p396_p13 }
  0xa9   : > { %v170_v10 = vpop.xlane.xlu0 %169 }
  0xaa   : > { %v171_v11 = vsub.f32 %v165_v5, %v170_v10  ;;  %vm209_vm2 = vcmp.ge.f32.partialorder %v166_v7, %v170_v10 }
  0xab   : > { %v337_v12 = vsel %vm209_vm2, 1.0, %v457_v8 }
  0xac   : > { %v172_v13 = vmul.f32 1.442695, %v171_v11  ;;  %v212_v14 = vmul.f32 %v337_v12, %v336_v9 }
  0xae   : > { %389 = vpow2.f32 %v172_v13 }
  0xb8   : > { %v390_v15 = vpop.eup %389 }
  0xb9   : > { %v174_v16 = vsel %vm167_vm0, %v390_v15, 0.0 }
  0xba   : > { %175 = vadd.xlane.f32.xlu0 %v174_v16 }
 0x147   : > { %v176_v18 = vpop.xlane.xlu0 %175 }
 0x148   : > { %391 = vlog2.f32 %v176_v18 }
 0x152   : > { %v392_v19 = vpop.eup %391 }
 0x153   : > { %v178_v20 = vmul.f32 0.6931472, %v392_v19 }
 0x155   : > { %v179_v21 = vadd.f32 %v178_v20, %v170_v10 }
 0x157   : > { %v180_v22 = vsub.f32 %v179_v21, %v166_v7 }
 0x159   : > { %184 = vrot.lane.b32.xlu1 %v180_v22, %s458_s30 }
 0x15d   : > { %214 = vrot.lane.b32.xlu1 %v212_v14, %s458_s30 }
 0x181   : > { %200 = vadd.xlane.f32.xlu1 %v199_v23 }
 0x1cb   : > { %v185_v24 = vpop.permute.xlu1 %184 }
 0x1cc   : > { %v187_v25 = vmul.f32 %v185_v24, %v182_v17 }
 0x1ce   : > { %v189_v26 = vsel %vm188_vm3, %v187_v25, 0.0 }
 0x1cf   : > { %190 = vadd.xlane.f32.xlu0 %v189_v26  ;;  %v215_v27 = vpop.permute.xlu1 %214 }
 0x1d0   : > { %v217_v28 = vsel %vm188_vm3, %v215_v27, 0.0 }
 0x1d3   : > { %218 = vadd.xlane.f32.xlu0 %v217_v28 }
 0x20e   : > { %v201_v29 = vpop.xlane.xlu1 %200 }
 0x20f   : > { %v202_v30 = vrot.slane %v201_v29, 4 }
 0x211   : > { %v203_v31 = vadd.f32 %v202_v30, %v201_v29 }
 0x213   : > { %v204_v32 = vrot.slane %v203_v31, 2 }
 0x215   : > { %v205_v36 = vadd.f32 %v204_v32, %v203_v31 }
 0x217   : > { %v206_v42 = vrot.slane %v205_v36, 1 }
 0x219   : > { %v207_v47 = vadd.f32 %v206_v42, %v205_v36 }
 0x25c   : > { %v191_v33 = vpop.xlane.xlu0 %190 }
 0x25d   : > { %v192_v34 = vrot.slane %v191_v33, 4 }
 0x25f   : > { %v193_v35 = vadd.f32 %v192_v34, %v191_v33 }
 0x260   : > { %v219_v37 = vpop.xlane.xlu0 %218 }
 0x261   : > { %v194_v38 = vrot.slane %v193_v35, 2  ;;  %v220_v39 = vrot.slane %v219_v37, 4 }
 0x263   : > { %v221_v40 = vadd.f32 %v220_v39, %v219_v37  ;;  %v195_v41 = vadd.f32 %v194_v38, %v193_v35 }
 0x265   : > { %v222_v43 = vrot.slane %v221_v40, 2  ;;  %v196_v44 = vrot.slane %v195_v41, 1 }
 0x267   : > { %v223_v45 = vadd.f32 %v222_v43, %v221_v40  ;;  %v197_v46 = vadd.f32 %v196_v44, %v195_v41 }
 0x269   : > { %342 = vpush %v197_v46  ;;  %v224_v48 = vrot.slane %v223_v45, 1 }
 0x26a   : > { %344 = vpush %v207_v47 }
 0x26b   : > { %v225_v49 = vadd.f32 %v224_v48, %v223_v45 }
 0x26d   : > { %346 = vpush %v225_v49 }
 0x29a   : > { %s343_s5 = spop %342 }
 0x29b   : > { %s345_s6 = spop %344  ;;  %v240_v54 = vstv %s343_s5 }
 0x29c   : > { %v238_v52 = vstv %s345_s6 }
 0x29e   : > { %s347_s8 = spop %346 }
 0x29f   : > { %v236_v51 = vstv %s347_s8 }
 0x2a0   : > { %v237_v53 = vsel %vm235_vm8, %v236_v51, 0.0 }
 0x2a1   : > { %v239_v55 = vsel %vm233_vm9, %v238_v52, %v237_v53 }
 0x2a2   : > { %v241_v56 = vsel %vm231_vm10, %v240_v54, %v239_v55 }
 0x2a3   : > { %242 = vst [vmem:[%s147_s14] sm:$0xff] %v241_v56 }
 0x2a4   : > { %406 = shalt.err (!%p403_p3)
}
 0x2a5   : > { %s407_s27 = scalar_lea.hbm %s545_s22, 128  ;;  %s411_s30 = scalar_lea.hbm %s589_s2, 256 }
 0x2a6   : > { %p408_p4 = scmp.ne.s32.totalorder %s545_s22, %s407_s27  ;;  %p412_p9 = scmp.lt.u32.totalorder %s545_s22, %s589_s2 }
 0x2a7   : > { %p413_p10 = scmp.lt.u32.totalorder %s411_s30, %s407_s27  ;;  %p415_p12 = scmp.lt.u32.totalorder %s407_s27, %s545_s22 }
 0x2a8   : > { %p409_p7 = pnand %p408_p4, %p513_p5 }
 0x2a9   : > { %p414_p11 = por %p413_p10, %p412_p9 }
 0x2aa   : > { %p410_p8 = pneg %p409_p7 }
 0x2ab   : > { %p416_p13 = por %p415_p12, %p414_p11 }
 0x2ad   : > { %p417_p0 = pnand %p416_p13, %p410_p8 }
 0x2af   : > { %420 = shalt.err (!%p417_p0)
}
 0x2b0   : > { %348 = dma.vmem_to_hbm [thread:$0]  (%p513_p5), %s547_s16, 128, %s545_s22, %s244_s13  }
 0x2b1 PF: > { %p354_p1 = scmp.ge.s32.totalorder %s455_s12, 2  ;;  %s269_s5 = sand.u32 1, %s443_s9  }
 0x2b2   : > { %s270_s6 = scalar_lea.sflag [#allocation3], %s269_s5 }
 0x2b3   : > { %p351_p2 = pnand %p354_p1, %p517_p6 }
 0x2b5   : > { %438 = dma.done.wait (!%p351_p2), %s270_s6, 128  }
 0x2b6   : > { %440 = vsyncadd (!%p351_p2), %s270_s6, 4294967168  ;;  %p12_p3 = scmp.ge.s32.totalorder %s500_s15, 4   ;;  %s592_s9 = smov %s447_s10 }
 0x2b7   : > { %s593_s10 = smov %s451_s11  ;;  %s594_s11 = smov %s511_s18 }
 0x2b8   : > { %s595_s12 = smov %s500_s15  ;;  %14 = sbr.rel (!%p12_p3) target bundleno = 3 (0x3), region = 66 }
 0x2bf   :  { %275 = vsyncpa [#allocation3], 1 }
 0x2c0   :  { %277 = vsyncpa [#allocation3 + $0x1], 1 }

</bundles_post_ra>
